<compile_context>
chip_gen: v5e
topology: v5e:2x2
jax: 0.10.0
libtpu: 0.0.40
codegen_flags: <defaults>
</compile_context>

<pallas_src>
import jax
import jax.numpy as jnp
from jax.experimental import pallas as pl
from jax.experimental.pallas import tpu as pltpu


def _policy_kernel(x_ref, w1_ref, b1_ref, w2_ref, b2_ref, w3_ref, b3_ref, o_ref):
    # x tile arrives f32 from HBM; matmul operands go to the MXU as bf16,
    # accumulation is f32, element-wise math (bias, ReLU, sigmoid) is f32.
    x = x_ref[...].astype(jnp.bfloat16)

    # fc1 + ReLU
    h = jnp.dot(x, w1_ref[...], preferred_element_type=jnp.float32) + b1_ref[...]
    h = jnp.maximum(h, 0.0)

    # fc2 + ReLU
    h = jnp.dot(h.astype(jnp.bfloat16), w2_ref[...],
                preferred_element_type=jnp.float32) + b2_ref[...]
    h = jnp.maximum(h, 0.0)

    # fc3 + sigmoid -> narrow (tb, out_size) store; masked vst is free filler
    # here (the kernel is HBM/overhead bound, not vst-slot bound).
    h = jnp.dot(h.astype(jnp.bfloat16), w3_ref[...],
                preferred_element_type=jnp.float32) + b3_ref[...]
    o_ref[...] = jax.nn.sigmoid(h)


def simple_policy_net(x, params, *, tile_b=4096):
    """x: [batch, input_size] float32 (or bf16).  params: dict of f32 weights/biases."""
    w1, b1 = params["w1"], params["b1"]
    w2, b2 = params["w2"], params["b2"]
    w3, b3 = params["w3"], params["b3"]

    batch, in_size = x.shape
    hidden = w1.shape[1]
    out_size = w3.shape[1]

    # --- batch tiling: largest tile <= tile_b, multiple of 8 sublanes.
    # No wrapper padding: grid = cdiv(batch, tb); Pallas clips the last block.
    tb = min(tile_b, ((batch + 7) // 8) * 8)
    tb = max(8, (tb // 8) * 8)
    # v7x has 2 TensorCores: if a single tile would cover a large batch, split
    # into two tiles so "parallel" can shard the grid across both cores.
    # (For small batches a single tile is fine; don't shrink below ~1k rows.)
    if batch > tb and False:  # unreachable guard, kept for clarity
        pass
    if pl.cdiv(batch, tb) == 1 and batch >= 2048:
        tb = ((pl.cdiv(batch, 2) + 7) // 8) * 8
    num_tiles = pl.cdiv(batch, tb)

    # --- weights: bf16 MXU operands (halves weight DMA), biases f32 (1, N) rows.
    w1b = w1.astype(jnp.bfloat16)
    w2b = w2.astype(jnp.bfloat16)
    w3b = w3.astype(jnp.bfloat16)
    b1r = b1.reshape(1, -1).astype(jnp.float32)
    b2r = b2.reshape(1, -1).astype(jnp.float32)
    b3r = b3.reshape(1, -1).astype(jnp.float32)

    # Weights/biases: full-array blocks, index_map always (0, 0) -> VMEM-resident
    # across all grid steps (Pallas re-uses the same buffer, no re-DMA).
    resident = lambda a: pl.BlockSpec(a.shape, lambda i: (0,) * a.ndim)

    # Advisory cost estimate so XLA can overlap neighbours with this
    # memory-bound kernel.
    weight_bytes = (w1b.size + w2b.size + w3b.size) * 2 + (b1r.size + b2r.size + b3r.size) * 4
    cost = pl.CostEstimate(
        flops=2 * batch * (in_size * hidden + hidden * hidden + hidden * out_size),
        transcendentals=batch * out_size,
        bytes_accessed=batch * (in_size * x.dtype.itemsize + out_size * 4) + weight_bytes,
    )

    out = pl.pallas_call(
        _policy_kernel,
        out_shape=jax.ShapeDtypeStruct((batch, out_size), jnp.float32),
        grid_spec=pltpu.PrefetchScalarGridSpec(
            num_scalar_prefetch=0,
            grid=(num_tiles,),
            in_specs=[
                pl.BlockSpec((tb, in_size), lambda i: (i, 0)),  # x: tiled over batch
                resident(w1b), resident(b1r),
                resident(w2b), resident(b2r),
                resident(w3b), resident(b3r),
            ],
            out_specs=pl.BlockSpec((tb, out_size), lambda i: (i, 0)),
        ),
        compiler_params=pltpu.CompilerParams(
            dimension_semantics=("parallel",),  # shard batch tiles across TCs (v7x)
        ),
        cost_estimate=cost,
    )(x, w1b, b1r, w2b, b2r, w3b, b3r)

    return out


def init_params(key, input_size, hidden_size, output_size):
    """Deterministic parameter init (PyTorch-style uniform ranges)."""
    ks = jax.random.split(key, 6)

    def linear(kw, kb, fan_in, fan_out):
        bound = 1.0 / jnp.sqrt(fan_in)
        # stored as (in, out) — transposed vs. PyTorch's (out, in)
        w = jax.random.uniform(kw, (fan_in, fan_out), jnp.float32, -bound, bound)
        b = jax.random.uniform(kb, (fan_out,), jnp.float32, -bound, bound)
        return w, b

    w1, b1 = linear(ks[0], ks[1], input_size, hidden_size)
    w2, b2 = linear(ks[2], ks[3], hidden_size, hidden_size)
    w3, b3 = linear(ks[4], ks[5], hidden_size, output_size)
    return {"w1": w1, "b1": b1, "w2": w2, "b2": b2, "w3": w3, "b3": b3}


def _ref_f32(x, p):
    h = jnp.maximum(x @ p["w1"] + p["b1"], 0.0)
    h = jnp.maximum(h @ p["w2"] + p["b2"], 0.0)
    return jax.nn.sigmoid(h @ p["w3"] + p["b3"])


def _ref_bf16(x, p):
    # Same bf16-operand / f32-accumulate math as the kernel.
    h = jnp.dot(x.astype(jnp.bfloat16), p["w1"].astype(jnp.bfloat16),
                preferred_element_type=jnp.float32) + p["b1"]
    h = jnp.maximum(h, 0.0)
    h = jnp.dot(h.astype(jnp.bfloat16), p["w2"].astype(jnp.bfloat16),
                preferred_element_type=jnp.float32) + p["b2"]
    h = jnp.maximum(h, 0.0)
    h = jnp.dot(h.astype(jnp.bfloat16), p["w3"].astype(jnp.bfloat16),
                preferred_element_type=jnp.float32) + p["b3"]
    return jax.nn.sigmoid(h)


if __name__ == "__main__":
    input_size, hidden_size, output_size = 32, 16, 4
    key = jax.random.PRNGKey(0)
    kx, kp, kx2 = jax.random.split(key, 3)
    params = init_params(kp, input_size, hidden_size, output_size)

    # Small batch (single tile, exact multiple of 8).
    batch = 8
    x = jax.random.normal(kx, (batch, input_size), jnp.float32)
    out = jax.block_until_ready(simple_policy_net(x, params))
    assert out.shape == (batch, output_size)
    assert jnp.allclose(out, _ref_bf16(x, params), atol=1e-3, rtol=1e-3)
    assert jnp.allclose(out, _ref_f32(x, params), atol=5e-2, rtol=5e-2)

    # Larger, non-divisible batch with a small tile to exercise the
    # multi-tile grid + ragged last block (no wrapper padding) path.
    batch2 = 530
    x2 = jax.random.normal(kx2, (batch2, input_size), jnp.float32)
    out2 = jax.block_until_ready(simple_policy_net(x2, params, tile_b=256))
    assert out2.shape == (batch2, output_size)
    assert jnp.allclose(out2, _ref_bf16(x2, params), atol=1e-3, rtol=1e-3)
    assert jnp.allclose(out2, _ref_f32(x2, params), atol=5e-2, rtol=5e-2)

    print("KERNEL_OK")
</pallas_src>

<mosaic_0001>
module attributes {stable_mosaic.version = 11 : i64} {
  func.func @_policy_kernel(%arg0: i32, %arg1: memref<8x32xf32, #tpu.memory_space<vmem>>, %arg2: memref<32x16xbf16, #tpu.memory_space<vmem>>, %arg3: memref<1x16xf32, #tpu.memory_space<vmem>>, %arg4: memref<16x16xbf16, #tpu.memory_space<vmem>>, %arg5: memref<1x16xf32, #tpu.memory_space<vmem>>, %arg6: memref<16x4xbf16, #tpu.memory_space<vmem>>, %arg7: memref<1x4xf32, #tpu.memory_space<vmem>>, %arg8: memref<8x4xf32, #tpu.memory_space<vmem>>) attributes {dimension_semantics = [#tpu.dimension_semantics<parallel>], iteration_bounds = array<i64: 1>, scalar_prefetch = 0 : i64, scratch_operands = 0 : i64, tpu.core_type = #tpu.core_type<tc>, window_params = [{transform_indices = @transform_0, window_bounds = array<i64: 8, 32>}, {pipeline_mode = #tpu.pipeline_mode<synchronous>, transform_indices = @transform_1, window_bounds = array<i64: 32, 16>}, {pipeline_mode = #tpu.pipeline_mode<synchronous>, transform_indices = @transform_2, window_bounds = array<i64: 1, 16>}, {pipeline_mode = #tpu.pipeline_mode<synchronous>, transform_indices = @transform_3, window_bounds = array<i64: 16, 16>}, {pipeline_mode = #tpu.pipeline_mode<synchronous>, transform_indices = @transform_4, window_bounds = array<i64: 1, 16>}, {pipeline_mode = #tpu.pipeline_mode<synchronous>, transform_indices = @transform_5, window_bounds = array<i64: 16, 4>}, {pipeline_mode = #tpu.pipeline_mode<synchronous>, transform_indices = @transform_6, window_bounds = array<i64: 1, 4>}, {transform_indices = @transform_7, window_bounds = array<i64: 8, 4>}]} {
    %c0 = arith.constant 0 : index
    %c0_0 = arith.constant 0 : index
    %0 = vector.load %arg1[%c0, %c0_0] : memref<8x32xf32, #tpu.memory_space<vmem>>, vector<8x32xf32>
    %1 = arith.truncf %0 : vector<8x32xf32> to vector<8x32xbf16>
    %c0_1 = arith.constant 0 : index
    %c0_2 = arith.constant 0 : index
    %2 = vector.load %arg2[%c0_1, %c0_2] : memref<32x16xbf16, #tpu.memory_space<vmem>>, vector<32x16xbf16>
    %cst = arith.constant dense<0.000000e+00> : vector<8x16xf32>
    %3 = tpu.matmul %1, %2, %cst {dimension_numbers = #tpu.dot_dimension_numbers<[1], [0], [0], [1], [0, 0, 1, 1], [], []>} : vector<8x32xbf16>, vector<32x16xbf16>, vector<8x16xf32> -> vector<8x16xf32>
    %c0_3 = arith.constant 0 : index
    %c0_4 = arith.constant 0 : index
    %4 = vector.load %arg3[%c0_3, %c0_4] : memref<1x16xf32, #tpu.memory_space<vmem>>, vector<1x16xf32>
    %5 = vector.broadcast %4 : vector<1x16xf32> to vector<8x16xf32>
    %6 = arith.addf %3, %5 : vector<8x16xf32>
    %cst_5 = arith.constant 0.000000e+00 : f32
    %7 = vector.broadcast %cst_5 : f32 to vector<8x16xf32>
    %8 = arith.maximumf %6, %7 : vector<8x16xf32>
    %9 = arith.truncf %8 : vector<8x16xf32> to vector<8x16xbf16>
    %c0_6 = arith.constant 0 : index
    %c0_7 = arith.constant 0 : index
    %10 = vector.load %arg4[%c0_6, %c0_7] : memref<16x16xbf16, #tpu.memory_space<vmem>>, vector<16x16xbf16>
    %cst_8 = arith.constant dense<0.000000e+00> : vector<8x16xf32>
    %11 = tpu.matmul %9, %10, %cst_8 {dimension_numbers = #tpu.dot_dimension_numbers<[1], [0], [0], [1], [0, 0, 1, 1], [], []>} : vector<8x16xbf16>, vector<16x16xbf16>, vector<8x16xf32> -> vector<8x16xf32>
    %c0_9 = arith.constant 0 : index
    %c0_10 = arith.constant 0 : index
    %12 = vector.load %arg5[%c0_9, %c0_10] : memref<1x16xf32, #tpu.memory_space<vmem>>, vector<1x16xf32>
    %13 = vector.broadcast %12 : vector<1x16xf32> to vector<8x16xf32>
    %14 = arith.addf %11, %13 : vector<8x16xf32>
    %cst_11 = arith.constant 0.000000e+00 : f32
    %15 = vector.broadcast %cst_11 : f32 to vector<8x16xf32>
    %16 = arith.maximumf %14, %15 : vector<8x16xf32>
    %17 = arith.truncf %16 : vector<8x16xf32> to vector<8x16xbf16>
    %c0_12 = arith.constant 0 : index
    %c0_13 = arith.constant 0 : index
    %18 = vector.load %arg6[%c0_12, %c0_13] : memref<16x4xbf16, #tpu.memory_space<vmem>>, vector<16x4xbf16>
    %cst_14 = arith.constant dense<0.000000e+00> : vector<8x4xf32>
    %19 = tpu.matmul %17, %18, %cst_14 {dimension_numbers = #tpu.dot_dimension_numbers<[1], [0], [0], [1], [0, 0, 1, 1], [], []>} : vector<8x16xbf16>, vector<16x4xbf16>, vector<8x4xf32> -> vector<8x4xf32>
    %c0_15 = arith.constant 0 : index
    %c0_16 = arith.constant 0 : index
    %20 = vector.load %arg7[%c0_15, %c0_16] : memref<1x4xf32, #tpu.memory_space<vmem>>, vector<1x4xf32>
    %21 = vector.broadcast %20 : vector<1x4xf32> to vector<8x4xf32>
    %22 = arith.addf %19, %21 : vector<8x4xf32>
    %23 = arith.negf %22 : vector<8x4xf32>
    %24 = math.exp %23 : vector<8x4xf32>
    %cst_17 = arith.constant 1.000000e+00 : f32
    %25 = vector.broadcast %cst_17 : f32 to vector<8x4xf32>
    %26 = arith.addf %25, %24 : vector<8x4xf32>
    %27 = arith.divf %25, %26 : vector<8x4xf32>
    %c0_18 = arith.constant 0 : index
    %c0_19 = arith.constant 0 : index
    %28 = vector.load %arg8[%c0_18, %c0_19] : memref<8x4xf32, #tpu.memory_space<vmem>>, vector<8x4xf32>
    tpu.vector_store %arg8[%c0_18, %c0_19], %27 {strides = array<i32>} : memref<8x4xf32, #tpu.memory_space<vmem>>, vector<8x4xf32>,
    return
  }
  func.func @transform_0(%arg0: i32) -> (i32, i32) {
    %c0_i32 = arith.constant 0 : i32
    %c0_i32_0 = arith.constant 0 : i32
    return %arg0, %c0_i32 : i32, i32
  }
  func.func @transform_1(%arg0: i32) -> (i32, i32) {
    %c0_i32 = arith.constant 0 : i32
    %c0_i32_0 = arith.constant 0 : i32
    %c0_i32_1 = arith.constant 0 : i32
    return %c0_i32, %c0_i32_0 : i32, i32
  }
  func.func @transform_2(%arg0: i32) -> (i32, i32) {
    %c0_i32 = arith.constant 0 : i32
    %c0_i32_0 = arith.constant 0 : i32
    %c0_i32_1 = arith.constant 0 : i32
    return %c0_i32, %c0_i32_0 : i32, i32
  }
  func.func @transform_3(%arg0: i32) -> (i32, i32) {
    %c0_i32 = arith.constant 0 : i32
    %c0_i32_0 = arith.constant 0 : i32
    %c0_i32_1 = arith.constant 0 : i32
    return %c0_i32, %c0_i32_0 : i32, i32
  }
  func.func @transform_4(%arg0: i32) -> (i32, i32) {
    %c0_i32 = arith.constant 0 : i32
    %c0_i32_0 = arith.constant 0 : i32
    %c0_i32_1 = arith.constant 0 : i32
    return %c0_i32, %c0_i32_0 : i32, i32
  }
  func.func @transform_5(%arg0: i32) -> (i32, i32) {
    %c0_i32 = arith.constant 0 : i32
    %c0_i32_0 = arith.constant 0 : i32
    %c0_i32_1 = arith.constant 0 : i32
    return %c0_i32, %c0_i32_0 : i32, i32
  }
  func.func @transform_6(%arg0: i32) -> (i32, i32) {
    %c0_i32 = arith.constant 0 : i32
    %c0_i32_0 = arith.constant 0 : i32
    %c0_i32_1 = arith.constant 0 : i32
    return %c0_i32, %c0_i32_0 : i32, i32
  }
  func.func @transform_7(%arg0: i32) -> (i32, i32) {
    %c0_i32 = arith.constant 0 : i32
    %c0_i32_0 = arith.constant 0 : i32
    return %arg0, %c0_i32 : i32, i32
  }
}

</mosaic_0001>

<bundles_post_ra>
// kernel: tpu_custom_call.1
= control target key start
LH: loop header
LB: loop body
LE: loop exit
PB: predicated region body
PF: predicated region fallthrough
CT: control target
= control target key end

     0   :  { %vm49_vm0 = vcmask 261120   ;;  %vm80_vm1 = vcmask 130048   ;;  %vm146_vm5 = vcmask 31744   ;;  %s250_s1 = inlined_call_operand.vmem [shape: bf16[32,16], index: 1, kind: input, shape index: {}]   ;;  %s251_s0 = inlined_call_operand.vmem [shape: f32[8,32], index: 0, kind: input, shape index: {}]   ;;  %s252_s2 = inlined_call_operand.vmem [shape: f32[1,16], index: 2, kind: input, shape index: {}]   ;;  %s253_s4 = inlined_call_operand.vmem [shape: f32[1,16], index: 4, kind: input, shape index: {}]   ;;  %s254_s3 = inlined_call_operand.vmem [shape: bf16[16,16], index: 3, kind: input, shape index: {}]   ;;  %s255_s6 = inlined_call_operand.vmem [shape: f32[1,4], index: 6, kind: input, shape index: {}]   ;;  %s256_s5 = inlined_call_operand.vmem [shape: bf16[16,4], index: 5, kind: input, shape index: {}]   ;;  %s257_s7 = inlined_call_operand.vmem [shape: f32[8,4], index: 7, kind: output, shape index: {}]  }
   0x1   :  { %v173_v0 = vld [vmem:[%s250_s1 + $0x8] sm:$0xff]  ;;  %v172_v1 = vld [vmem:[%s250_s1] sm:$0xff] }
   0x2   :  { %59 = vmatpush.bf16.msra.mxu0 %v173_v0  ;;  %v27_v2 = vld [vmem:[%s251_s0] sm:$0xff] }
   0x3   :  { %v28_v3 = vpack.c.bf16 %v27_v2, %v27_v2  ;;  %v174_v4 = vld [vmem:[%s254_s3] sm:$0xff] }
   0x4   :  { %91 = vmatpush.bf16.msra.mxu1 %v174_v4  ;;  %v176_v5 = vld [vmem:[%s252_s2] ss:$0 sm:$0xff] }
   0x5   :  { %v175_v11 = vld [vmem:[%s256_s5] sm:$0xff] }
   0x6   :  { %60 = vmatpush.bf16.msra.mxu0 %v172_v1  ;;  %121 = vmatpush.bf16.msra.mxu2 %v175_v11  ;;  %v177_v12 = vld [vmem:[%s253_s4] ss:$0 sm:$0xff] }
   0x7   :  { %v178_v18 = vld [vmem:[%s255_s6] ss:$0 sm:$0xff] }
   0x9   :  { %160 = vmatmul.msk.bf16.vlgmr.msra.gmra.mxu0 %vm49_vm0, %v28_v3 }
  0x86   :  { %v62_v6 = vpop.f32.mrf.mxu0 }
  0x87   :  { %v63_v7 = vadd.f32 %v176_v5, %v62_v6 }
  0x89   :  { %v66_v8 = vmax.f32 %v63_v7, 0.0 }
  0x8b   :  { %v67_v9 = vpack.c.bf16 %v66_v8, %v66_v8 }
  0x8d   :  { %165 = vmatmul.msk.bf16.vlgmr.msra.gmra.mxu1 %vm80_vm1, %v67_v9 }
  0x8e   :  { %v64_v10 = vpop.f32.mrf.mxu0 }
 0x10a   :  { %v93_v13 = vpop.f32.mrf.mxu1 }
 0x10b   :  { %v94_v14 = vadd.f32 %v177_v12, %v93_v13 }
 0x10d   :  { %v97_v15 = vmax.f32 %v94_v14, 0.0 }
 0x10f   :  { %v98_v16 = vpack.c.bf16 %v97_v15, %v97_v15 }
 0x111   :  { %170 = vmatmul.msk.bf16.vlgmr.msra.gmra.mxu2 %vm80_vm1, %v98_v16 }
 0x112   :  { %v95_v17 = vpop.f32.mrf.mxu1 }
 0x194   :  { %v123_v19 = vpop.f32.mrf.mxu2 }
 0x195   :  { %v124_v20 = vadd.f32 %v178_v18, %v123_v19 }
 0x197   :  { %v171_v21 = vmul.f32 -1.442695, %v124_v20 }
 0x199   :  { %179 = vpow2.f32 %v171_v21 }
 0x19c   :  { %v125_v22 = vpop.f32.mrf.mxu2 }
 0x19f   :  { %v180_v23 = vpop.eup %179 }
 0x1a0   :  { %v130_v24 = vadd.f32 1.0, %v180_v23 }
 0x1a2   :  { %181 = vrcp.f32 %v130_v24  ;;  %v142_v28 = vand.u32 2147483648, %v130_v24  ;;  %v140_v30 = vand.u32 2147483647, %v130_v24  ;;  %vm136_vm3 = vweird.f32 %v130_v24 }
 0x1a4   :  { %v143_v32 = vor.u32 1.1754944e-38, %v142_v28  ;;  %vm141_vm6 = vcmp.eq.f32.partialorder %v140_v30, 8.507059e+37 }
 0x1a8   :  { %v182_v25 = vpop.eup %181 }
 0x1a9   :  { %v132_v26 = vmul.f32 %v182_v25, %v130_v24  ;;  %vm137_vm2 = vweird.f32 %v182_v25 }
 0x1aa   :  { %vm138_vm4 = vmor %vm136_vm3, %vm137_vm2 }
 0x1ab   :  { %v133_v27 = vsub.f32 1.0, %v132_v26 }
 0x1ad   :  { %v134_v29 = vmul.f32 %v182_v25, %v133_v27 }
 0x1af   :  { %v135_v31 = vadd.f32 %v182_v25, %v134_v29 }
 0x1b1   :  { %v139_v33 = vsel %vm138_vm4, %v182_v25, %v135_v31 }
 0x1b2   :  { %v144_v34 = vsel %vm141_vm6, %v143_v32, %v139_v33 }
 0x1b3   :  { %147 = vst.msk [vmem:[%s257_s7] sm:$0xff] %vm146_vm5, %v144_v34 }

</bundles_post_ra>
